<compile_context>
chip_gen: v5e
topology: v5e:2x2
jax: 0.10.0
libtpu: 0.0.40
codegen_flags: <defaults>
</compile_context>

<pallas_src>
import functools
import math

import jax
import jax.numpy as jnp
from jax.experimental import pallas as pl
from jax.experimental.pallas import tpu as pltpu


def _round_up(x, m):
    return (x + m - 1) // m * m


def _resident_spec(shape):
    """BlockSpec for a weight/bias fetched once and kept resident.

    Constant index map; single-buffered (double-buffering a block whose index
    never changes only doubles its VMEM footprint)."""
    index_map = lambda *_: (0,) * len(shape)
    try:
        return pl.BlockSpec(shape, index_map, pipeline_mode=pl.Buffered(1))
    except Exception:  # older jax without pipeline_mode support
        return pl.BlockSpec(shape, index_map)


def _vmem_limit_bytes(estimate):
    """Explicit scoped-VMEM limit: >= 32 MiB default, <= ~3/4 of capacity."""
    try:
        cap = pltpu.get_tpu_info().vmem_capacity_bytes
    except Exception:
        cap = 64 * 1024 * 1024  # v7x per-TensorCore capacity (the smallest)
    lo = 32 * 1024 * 1024
    hi = max(lo, (cap * 3) // 4)
    return int(min(max(2 * int(estimate), lo), hi))


def _qkv_proj_kernel(x_ref, wq_ref, wk_ref, wv_ref, bq_ref, bk_ref, bv_ref,
                     q_ref, k_ref, v_ref, *, num_heads, head_dim, scale):
    """Project one sequence tile of x into head-major Q (pre-scaled), K, V.

    x_ref:  (1, ts, C)  MXU dtype
    w*_ref: (C, C)      pre-transposed (in -> out), MXU dtype
    b*_ref: (1, C)      float32
    q/k/v_ref: (1, H, ts, D)  MXU dtype
    """
    H, D = num_heads, head_dim
    x = x_ref[0]                                                    # (ts, C)
    q = (jnp.dot(x, wq_ref[...], preferred_element_type=jnp.float32)
         + bq_ref[...]) * scale                                     # fold 1/sqrt(D)
    k = jnp.dot(x, wk_ref[...], preferred_element_type=jnp.float32) + bk_ref[...]
    v = jnp.dot(x, wv_ref[...], preferred_element_type=jnp.float32) + bv_ref[...]
    q = q.astype(q_ref.dtype)
    k = k.astype(k_ref.dtype)
    v = v.astype(v_ref.dtype)
    # The head relayout happens exactly once here (per projected element), so
    # the flash loop never slices sub-128-lane head chunks per key step.
    for h in range(H):
        lo = h * D
        q_ref[0, h] = q[:, lo:lo + D]
        k_ref[0, h] = k[:, lo:lo + D]
        v_ref[0, h] = v[:, lo:lo + D]


def _flash_attn_kernel(q_ref, k_ref, v_ref, o_ref, m_scr, l_scr, acc_scr,
                       *, kv_len, kv_tile, mask_keys):
    """Online-softmax attention for one (batch, head, query tile) over key tiles.

    q_ref: (1, 1, tq, D) pre-scaled; k_ref/v_ref: (1, 1, tk, D)
    o_ref: (1, 1, tq, D); m/l_scr: (tq, 1) f32; acc_scr: (tq, D) f32
    """
    ki = pl.program_id(3)

    @pl.when(ki == 0)
    def _init():
        m_scr[...] = jnp.full(m_scr.shape, -1e30, m_scr.dtype)
        l_scr[...] = jnp.zeros(l_scr.shape, l_scr.dtype)
        acc_scr[...] = jnp.zeros(acc_scr.shape, acc_scr.dtype)

    q = q_ref[0, 0]                                                 # (tq, D)
    k = k_ref[0, 0]                                                 # (tk, D)
    s = jnp.einsum('qd,kd->qk', q, k,
                   preferred_element_type=jnp.float32)              # (tq, tk) f32
    if mask_keys:
        # Mask zero-padded key positions (sequence padded to a tile multiple).
        kpos = ki * kv_tile + jax.lax.broadcasted_iota(jnp.int32, s.shape, 1)
        s = jnp.where(kpos < kv_len, s, -1e30)

    # Softmax statistics stay f32 (v5e has no bf16 VPU/EUP).
    m_prev = m_scr[...]
    m_new = jnp.maximum(m_prev, jnp.max(s, axis=-1, keepdims=True))
    alpha = jnp.exp(m_prev - m_new)
    p = jnp.exp(s - m_new)
    l_scr[...] = alpha * l_scr[...] + jnp.sum(p, axis=-1, keepdims=True)
    acc_scr[...] = alpha * acc_scr[...] + jnp.dot(
        p.astype(v_ref.dtype), v_ref[0, 0], preferred_element_type=jnp.float32)
    m_scr[...] = m_new

    @pl.when(ki == pl.num_programs(3) - 1)
    def _finalize():
        # Exact reciprocal: runs once per tile, hidden under the pipeline.
        inv_l = pl.reciprocal(l_scr[...], approx=False)
        o_ref[0, 0] = (acc_scr[...] * inv_l).astype(o_ref.dtype)


def _out_proj_kernel(ctx_ref, wp_ref, bp_ref, o_ref, ctx_scr,
                     *, num_heads, head_dim):
    """Gather heads lane-dense and apply the output projection.

    ctx_ref: (1, H, tq, D); wp_ref: (C, C); bp_ref: (1, C) f32
    o_ref:   (1, tq, C);    ctx_scr: (tq, C) MXU dtype (VMEM scratch)
    """
    H, D = num_heads, head_dim
    # Write each head's context at its lane offset, then one C-deep matmul
    # (single MXU-efficient contraction, accumulator lives in VMEM not vregs).
    for h in range(H):
        ctx_scr[:, h * D:(h + 1) * D] = ctx_ref[0, h]
    y = jnp.dot(ctx_scr[...], wp_ref[...], preferred_element_type=jnp.float32)
    o_ref[0] = (y + bp_ref[...]).astype(o_ref.dtype)


def multi_head_attention(x, w_qkv, b_qkv, w_proj, b_proj, *, num_heads,
                         q_tile=256, kv_tile=256):
    """Forward pass of the PyTorch MultiHeadAttention module.

    x: (B, N, C). w_qkv: (3C, C) torch (out,in) layout, b_qkv: (3C,),
    w_proj: (C, C) torch layout, b_proj: (C,). Returns (B, N, C) in x.dtype.
    """
    B, N, C = x.shape
    H = num_heads
    D = C // H
    assert D * H == C, "embed_dim must be divisible by num_heads"
    out_dtype = x.dtype
    # Feed the MXU bf16 operands when the input is f32 (f32 accumulation).
    mxu_dtype = jnp.bfloat16 if x.dtype == jnp.float32 else x.dtype
    isz = jnp.dtype(mxu_dtype).itemsize

    # ---- tiles & padding (no "whole sequence in one tile" fallback) ------
    tq = min(q_tile, _round_up(N, 8))
    tk = min(kv_tile, _round_up(N, 8))
    Np = _round_up(N, math.lcm(tq, tk))           # padded sequence length
    ns, nq, nk = Np // tq, Np // tq, Np // tk
    mask_keys = Np != N

    # ---- parameters: torch (out,in) -> (in,out), MXU dtype; biases f32 ----
    w_qkv = jnp.asarray(w_qkv)
    wq_t = jnp.asarray(w_qkv[0 * C:1 * C].T, mxu_dtype)
    wk_t = jnp.asarray(w_qkv[1 * C:2 * C].T, mxu_dtype)
    wv_t = jnp.asarray(w_qkv[2 * C:3 * C].T, mxu_dtype)
    b_qkv = jnp.asarray(b_qkv, jnp.float32)
    bq = b_qkv[0 * C:1 * C].reshape(1, C)
    bk = b_qkv[1 * C:2 * C].reshape(1, C)
    bv = b_qkv[2 * C:3 * C].reshape(1, C)
    wp_t = jnp.asarray(jnp.asarray(w_proj).T, mxu_dtype)
    bp = jnp.asarray(b_proj, jnp.float32).reshape(1, C)

    xp = jnp.asarray(x, mxu_dtype)
    if Np != N:
        xp = jnp.pad(xp, ((0, 0), (0, Np - N), (0, 0)))

    scale = float(D) ** -0.5
    ts = tq  # sequence tile for the projection kernels

    # ---- 1) QKV projection: K/V are computed exactly once ----------------
    qkv_shape = jax.ShapeDtypeStruct((B, H, Np, D), mxu_dtype)
    vmem_a = _vmem_limit_bytes(
        (3 * C * C + 8 * ts * C) * isz + 3 * ts * C * 4 + 3 * C * 4)
    q_hm, k_hm, v_hm = pl.pallas_call(
        functools.partial(_qkv_proj_kernel, num_heads=H, head_dim=D,
                          scale=scale),
        grid=(B, ns),
        in_specs=[
            pl.BlockSpec((1, ts, C), lambda b, s: (b, s, 0)),
            _resident_spec((C, C)), _resident_spec((C, C)), _resident_spec((C, C)),
            _resident_spec((1, C)), _resident_spec((1, C)), _resident_spec((1, C)),
        ],
        out_specs=[pl.BlockSpec((1, H, ts, D), lambda b, s: (b, 0, s, 0))] * 3,
        out_shape=[qkv_shape] * 3,
        compiler_params=pltpu.CompilerParams(
            dimension_semantics=("parallel", "parallel"),
            vmem_limit_bytes=vmem_a),
    )(xp, wq_t, wk_t, wv_t, bq, bk, bv)

    # ---- 2) Flash attention over key tiles (streams K/V from HBM) --------
    vmem_b = _vmem_limit_bytes(
        (4 * tq * D + 8 * tk * D) * isz + (tq * D + 2 * tq + tq * tk) * 4)
    ctx = pl.pallas_call(
        functools.partial(_flash_attn_kernel, kv_len=N, kv_tile=tk,
                          mask_keys=mask_keys),
        grid=(B, H, nq, nk),
        in_specs=[
            pl.BlockSpec((1, 1, tq, D), lambda b, h, qi, ki: (b, h, qi, 0)),
            pl.BlockSpec((1, 1, tk, D), lambda b, h, qi, ki: (b, h, ki, 0)),
            pl.BlockSpec((1, 1, tk, D), lambda b, h, qi, ki: (b, h, ki, 0)),
        ],
        out_specs=pl.BlockSpec((1, 1, tq, D), lambda b, h, qi, ki: (b, h, qi, 0)),
        out_shape=jax.ShapeDtypeStruct((B, H, Np, D), mxu_dtype),
        scratch_shapes=[
            pltpu.VMEM((tq, 1), jnp.float32),   # running max m
            pltpu.VMEM((tq, 1), jnp.float32),   # running sum l
            pltpu.VMEM((tq, D), jnp.float32),   # unnormalized accumulator
        ],
        compiler_params=pltpu.CompilerParams(
            dimension_semantics=("parallel", "parallel", "parallel", "arbitrary"),
            vmem_limit_bytes=vmem_b),
    )(q_hm, k_hm, v_hm)

    # ---- 3) Output projection: ONE C-deep matmul per query tile ----------
    vmem_c = _vmem_limit_bytes(
        (C * C + 2 * H * tq * D + tq * C) * isz
        + 2 * tq * C * jnp.dtype(out_dtype).itemsize + C * 4)
    out = pl.pallas_call(
        functools.partial(_out_proj_kernel, num_heads=H, head_dim=D),
        grid=(B, nq),
        in_specs=[
            pl.BlockSpec((1, H, tq, D), lambda b, qi: (b, 0, qi, 0)),
            _resident_spec((C, C)),
            _resident_spec((1, C)),
        ],
        out_specs=pl.BlockSpec((1, tq, C), lambda b, qi: (b, qi, 0)),
        out_shape=jax.ShapeDtypeStruct((B, Np, C), out_dtype),
        scratch_shapes=[pltpu.VMEM((tq, C), mxu_dtype)],
        compiler_params=pltpu.CompilerParams(
            dimension_semantics=("parallel", "parallel"),
            vmem_limit_bytes=vmem_c),
    )(ctx, wp_t, bp)

    if Np != N:
        out = out[:, :N, :]
    return out


def _reference(x, w_qkv, b_qkv, w_proj, b_proj, num_heads):
    B, N, C = x.shape
    D = C // num_heads
    qkv = x @ w_qkv.T + b_qkv                                        # (B, N, 3C)
    qkv = qkv.reshape(B, N, 3, num_heads, D).transpose(2, 0, 3, 1, 4)
    q, k, v = qkv[0], qkv[1], qkv[2]                                 # (B, H, N, D)
    attn = (q @ k.transpose(0, 1, 3, 2)) * (D ** -0.5)
    attn = jax.nn.softmax(attn, axis=-1)
    out = (attn @ v).transpose(0, 2, 1, 3).reshape(B, N, C)
    return out @ w_proj.T + b_proj


if __name__ == "__main__":
    B, N, C = 2, 8, 32
    num_heads = 4

    key = jax.random.PRNGKey(0)
    kx, kw1, kb1, kw2, kb2 = jax.random.split(key, 5)

    x = jax.random.normal(kx, (B, N, C), dtype=jnp.float32)
    # torch nn.Linear-style parameter shapes (out_features, in_features)
    w_qkv = jax.random.normal(kw1, (3 * C, C), dtype=jnp.float32) * 0.1
    b_qkv = jax.random.normal(kb1, (3 * C,), dtype=jnp.float32) * 0.1
    w_proj = jax.random.normal(kw2, (C, C), dtype=jnp.float32) * 0.1
    b_proj = jax.random.normal(kb2, (C,), dtype=jnp.float32) * 0.1

    out = multi_head_attention(x, w_qkv, b_qkv, w_proj, b_proj,
                               num_heads=num_heads)
    out = jax.block_until_ready(out)
    assert out.shape == (B, N, C)

    ref = _reference(x, w_qkv, b_qkv, w_proj, b_proj, num_heads)
    # Tolerance: MXU operands are bf16 (per review) with f32 accumulation;
    # softmax statistics and the normalization reciprocal are exact f32.
    err = jnp.max(jnp.abs(out - ref))
    assert jnp.allclose(out, ref, atol=2e-2, rtol=2e-2), f"max abs diff {err}"

    print("KERNEL_OK")
</pallas_src>

<mosaic_0001>
module attributes {stable_mosaic.version = 11 : i64} {
  func.func @_qkv_proj_kernel(%arg0: i32, %arg1: i32, %arg2: memref<1x8x32xbf16, #tpu.memory_space<vmem>>, %arg3: memref<32x32xbf16, #tpu.memory_space<vmem>>, %arg4: memref<32x32xbf16, #tpu.memory_space<vmem>>, %arg5: memref<32x32xbf16, #tpu.memory_space<vmem>>, %arg6: memref<1x32xf32, #tpu.memory_space<vmem>>, %arg7: memref<1x32xf32, #tpu.memory_space<vmem>>, %arg8: memref<1x32xf32, #tpu.memory_space<vmem>>, %arg9: memref<1x4x8x8xbf16, #tpu.memory_space<vmem>>, %arg10: memref<1x4x8x8xbf16, #tpu.memory_space<vmem>>, %arg11: memref<1x4x8x8xbf16, #tpu.memory_space<vmem>>) attributes {dimension_semantics = [#tpu.dimension_semantics<parallel>, #tpu.dimension_semantics<parallel>], iteration_bounds = array<i64: 2, 1>, scalar_prefetch = 0 : i64, scratch_operands = 0 : i64, tpu.core_type = #tpu.core_type<tc>, window_params = [{transform_indices = @transform_0, window_bounds = array<i64: 1, 8, 32>}, {pipeline_mode = #tpu.pipeline_mode<synchronous>, transform_indices = @transform_1, window_bounds = array<i64: 32, 32>}, {pipeline_mode = #tpu.pipeline_mode<synchronous>, transform_indices = @transform_2, window_bounds = array<i64: 32, 32>}, {pipeline_mode = #tpu.pipeline_mode<synchronous>, transform_indices = @transform_3, window_bounds = array<i64: 32, 32>}, {pipeline_mode = #tpu.pipeline_mode<synchronous>, transform_indices = @transform_4, window_bounds = array<i64: 1, 32>}, {pipeline_mode = #tpu.pipeline_mode<synchronous>, transform_indices = @transform_5, window_bounds = array<i64: 1, 32>}, {pipeline_mode = #tpu.pipeline_mode<synchronous>, transform_indices = @transform_6, window_bounds = array<i64: 1, 32>}, {transform_indices = @transform_7, window_bounds = array<i64: 1, 4, 8, 8>}, {transform_indices = @transform_8, window_bounds = array<i64: 1, 4, 8, 8>}, {transform_indices = @transform_9, window_bounds = array<i64: 1, 4, 8, 8>}]} {
    %c0 = arith.constant 0 : index
    %c0_0 = arith.constant 0 : index
    %c0_1 = arith.constant 0 : index
    %0 = vector.load %arg2[%c0, %c0_0, %c0_1] : memref<1x8x32xbf16, #tpu.memory_space<vmem>>, vector<1x8x32xbf16>
    %1 = vector.shape_cast %0 : vector<1x8x32xbf16> to vector<8x32xbf16>
    %c0_2 = arith.constant 0 : index
    %c0_3 = arith.constant 0 : index
    %2 = vector.load %arg3[%c0_2, %c0_3] : memref<32x32xbf16, #tpu.memory_space<vmem>>, vector<32x32xbf16>
    %cst = arith.constant dense<0.000000e+00> : vector<8x32xf32>
    %3 = tpu.matmul %1, %2, %cst {dimension_numbers = #tpu.dot_dimension_numbers<[1], [0], [0], [1], [0, 0, 1, 1], [], []>} : vector<8x32xbf16>, vector<32x32xbf16>, vector<8x32xf32> -> vector<8x32xf32>
    %c0_4 = arith.constant 0 : index
    %c0_5 = arith.constant 0 : index
    %4 = vector.load %arg6[%c0_4, %c0_5] : memref<1x32xf32, #tpu.memory_space<vmem>>, vector<1x32xf32>
    %5 = vector.broadcast %4 : vector<1x32xf32> to vector<8x32xf32>
    %6 = arith.addf %3, %5 : vector<8x32xf32>
    %cst_6 = arith.constant 0.353553385 : f32
    %7 = vector.broadcast %cst_6 : f32 to vector<8x32xf32>
    %8 = arith.mulf %6, %7 : vector<8x32xf32>
    %c0_7 = arith.constant 0 : index
    %c0_8 = arith.constant 0 : index
    %9 = vector.load %arg4[%c0_7, %c0_8] : memref<32x32xbf16, #tpu.memory_space<vmem>>, vector<32x32xbf16>
    %cst_9 = arith.constant dense<0.000000e+00> : vector<8x32xf32>
    %10 = tpu.matmul %1, %9, %cst_9 {dimension_numbers = #tpu.dot_dimension_numbers<[1], [0], [0], [1], [0, 0, 1, 1], [], []>} : vector<8x32xbf16>, vector<32x32xbf16>, vector<8x32xf32> -> vector<8x32xf32>
    %c0_10 = arith.constant 0 : index
    %c0_11 = arith.constant 0 : index
    %11 = vector.load %arg7[%c0_10, %c0_11] : memref<1x32xf32, #tpu.memory_space<vmem>>, vector<1x32xf32>
    %12 = vector.broadcast %11 : vector<1x32xf32> to vector<8x32xf32>
    %13 = arith.addf %10, %12 : vector<8x32xf32>
    %c0_12 = arith.constant 0 : index
    %c0_13 = arith.constant 0 : index
    %14 = vector.load %arg5[%c0_12, %c0_13] : memref<32x32xbf16, #tpu.memory_space<vmem>>, vector<32x32xbf16>
    %cst_14 = arith.constant dense<0.000000e+00> : vector<8x32xf32>
    %15 = tpu.matmul %1, %14, %cst_14 {dimension_numbers = #tpu.dot_dimension_numbers<[1], [0], [0], [1], [0, 0, 1, 1], [], []>} : vector<8x32xbf16>, vector<32x32xbf16>, vector<8x32xf32> -> vector<8x32xf32>
    %c0_15 = arith.constant 0 : index
    %c0_16 = arith.constant 0 : index
    %16 = vector.load %arg8[%c0_15, %c0_16] : memref<1x32xf32, #tpu.memory_space<vmem>>, vector<1x32xf32>
    %17 = vector.broadcast %16 : vector<1x32xf32> to vector<8x32xf32>
    %18 = arith.addf %15, %17 : vector<8x32xf32>
    %19 = arith.truncf %8 : vector<8x32xf32> to vector<8x32xbf16>
    %20 = arith.truncf %13 : vector<8x32xf32> to vector<8x32xbf16>
    %21 = arith.truncf %18 : vector<8x32xf32> to vector<8x32xbf16>
    %22 = vector.extract_strided_slice %19 {offsets = [0, 0], sizes = [8, 8], strides = [1, 1]} : vector<8x32xbf16> to vector<8x8xbf16>
    %c0_17 = arith.constant 0 : index
    %c0_18 = arith.constant 0 : index
    %c0_19 = arith.constant 0 : index
    %c0_20 = arith.constant 0 : index
    %23 = vector.load %arg9[%c0_17, %c0_18, %c0_19, %c0_20] : memref<1x4x8x8xbf16, #tpu.memory_space<vmem>>, vector<1x1x8x8xbf16>
    %24 = vector.shape_cast %23 : vector<1x1x8x8xbf16> to vector<8x8xbf16>
    %25 = vector.shape_cast %22 : vector<8x8xbf16> to vector<1x1x8x8xbf16>
    tpu.vector_store %arg9[%c0_17, %c0_18, %c0_19, %c0_20], %25 {strides = array<i32>} : memref<1x4x8x8xbf16, #tpu.memory_space<vmem>>, vector<1x1x8x8xbf16>,
    %26 = vector.extract_strided_slice %20 {offsets = [0, 0], sizes = [8, 8], strides = [1, 1]} : vector<8x32xbf16> to vector<8x8xbf16>
    %c0_21 = arith.constant 0 : index
    %c0_22 = arith.constant 0 : index
    %c0_23 = arith.constant 0 : index
    %c0_24 = arith.constant 0 : index
    %27 = vector.load %arg10[%c0_21, %c0_22, %c0_23, %c0_24] : memref<1x4x8x8xbf16, #tpu.memory_space<vmem>>, vector<1x1x8x8xbf16>
    %28 = vector.shape_cast %27 : vector<1x1x8x8xbf16> to vector<8x8xbf16>
    %29 = vector.shape_cast %26 : vector<8x8xbf16> to vector<1x1x8x8xbf16>
    tpu.vector_store %arg10[%c0_21, %c0_22, %c0_23, %c0_24], %29 {strides = array<i32>} : memref<1x4x8x8xbf16, #tpu.memory_space<vmem>>, vector<1x1x8x8xbf16>,
    %30 = vector.extract_strided_slice %21 {offsets = [0, 0], sizes = [8, 8], strides = [1, 1]} : vector<8x32xbf16> to vector<8x8xbf16>
    %c0_25 = arith.constant 0 : index
    %c0_26 = arith.constant 0 : index
    %c0_27 = arith.constant 0 : index
    %c0_28 = arith.constant 0 : index
    %31 = vector.load %arg11[%c0_25, %c0_26, %c0_27, %c0_28] : memref<1x4x8x8xbf16, #tpu.memory_space<vmem>>, vector<1x1x8x8xbf16>
    %32 = vector.shape_cast %31 : vector<1x1x8x8xbf16> to vector<8x8xbf16>
    %33 = vector.shape_cast %30 : vector<8x8xbf16> to vector<1x1x8x8xbf16>
    tpu.vector_store %arg11[%c0_25, %c0_26, %c0_27, %c0_28], %33 {strides = array<i32>} : memref<1x4x8x8xbf16, #tpu.memory_space<vmem>>, vector<1x1x8x8xbf16>,
    %34 = vector.extract_strided_slice %19 {offsets = [0, 8], sizes = [8, 8], strides = [1, 1]} : vector<8x32xbf16> to vector<8x8xbf16>
    %c0_29 = arith.constant 0 : index
    %c1 = arith.constant 1 : index
    %c0_30 = arith.constant 0 : index
    %c0_31 = arith.constant 0 : index
    %35 = vector.load %arg9[%c0_29, %c1, %c0_30, %c0_31] : memref<1x4x8x8xbf16, #tpu.memory_space<vmem>>, vector<1x1x8x8xbf16>
    %36 = vector.shape_cast %35 : vector<1x1x8x8xbf16> to vector<8x8xbf16>
    %37 = vector.shape_cast %34 : vector<8x8xbf16> to vector<1x1x8x8xbf16>
    tpu.vector_store %arg9[%c0_29, %c1, %c0_30, %c0_31], %37 {strides = array<i32>} : memref<1x4x8x8xbf16, #tpu.memory_space<vmem>>, vector<1x1x8x8xbf16>,
    %38 = vector.extract_strided_slice %20 {offsets = [0, 8], sizes = [8, 8], strides = [1, 1]} : vector<8x32xbf16> to vector<8x8xbf16>
    %c0_32 = arith.constant 0 : index
    %c1_33 = arith.constant 1 : index
    %c0_34 = arith.constant 0 : index
    %c0_35 = arith.constant 0 : index
    %39 = vector.load %arg10[%c0_32, %c1_33, %c0_34, %c0_35] : memref<1x4x8x8xbf16, #tpu.memory_space<vmem>>, vector<1x1x8x8xbf16>
    %40 = vector.shape_cast %39 : vector<1x1x8x8xbf16> to vector<8x8xbf16>
    %41 = vector.shape_cast %38 : vector<8x8xbf16> to vector<1x1x8x8xbf16>
    tpu.vector_store %arg10[%c0_32, %c1_33, %c0_34, %c0_35], %41 {strides = array<i32>} : memref<1x4x8x8xbf16, #tpu.memory_space<vmem>>, vector<1x1x8x8xbf16>,
    %42 = vector.extract_strided_slice %21 {offsets = [0, 8], sizes = [8, 8], strides = [1, 1]} : vector<8x32xbf16> to vector<8x8xbf16>
    %c0_36 = arith.constant 0 : index
    %c1_37 = arith.constant 1 : index
    %c0_38 = arith.constant 0 : index
    %c0_39 = arith.constant 0 : index
    %43 = vector.load %arg11[%c0_36, %c1_37, %c0_38, %c0_39] : memref<1x4x8x8xbf16, #tpu.memory_space<vmem>>, vector<1x1x8x8xbf16>
    %44 = vector.shape_cast %43 : vector<1x1x8x8xbf16> to vector<8x8xbf16>
    %45 = vector.shape_cast %42 : vector<8x8xbf16> to vector<1x1x8x8xbf16>
    tpu.vector_store %arg11[%c0_36, %c1_37, %c0_38, %c0_39], %45 {strides = array<i32>} : memref<1x4x8x8xbf16, #tpu.memory_space<vmem>>, vector<1x1x8x8xbf16>,
    %46 = vector.extract_strided_slice %19 {offsets = [0, 16], sizes = [8, 8], strides = [1, 1]} : vector<8x32xbf16> to vector<8x8xbf16>
    %c0_40 = arith.constant 0 : index
    %c2 = arith.constant 2 : index
    %c0_41 = arith.constant 0 : index
    %c0_42 = arith.constant 0 : index
    %47 = vector.load %arg9[%c0_40, %c2, %c0_41, %c0_42] : memref<1x4x8x8xbf16, #tpu.memory_space<vmem>>, vector<1x1x8x8xbf16>
    %48 = vector.shape_cast %47 : vector<1x1x8x8xbf16> to vector<8x8xbf16>
    %49 = vector.shape_cast %46 : vector<8x8xbf16> to vector<1x1x8x8xbf16>
    tpu.vector_store %arg9[%c0_40, %c2, %c0_41, %c0_42], %49 {strides = array<i32>} : memref<1x4x8x8xbf16, #tpu.memory_space<vmem>>, vector<1x1x8x8xbf16>,
    %50 = vector.extract_strided_slice %20 {offsets = [0, 16], sizes = [8, 8], strides = [1, 1]} : vector<8x32xbf16> to vector<8x8xbf16>
    %c0_43 = arith.constant 0 : index
    %c2_44 = arith.constant 2 : index
    %c0_45 = arith.constant 0 : index
    %c0_46 = arith.constant 0 : index
    %51 = vector.load %arg10[%c0_43, %c2_44, %c0_45, %c0_46] : memref<1x4x8x8xbf16, #tpu.memory_space<vmem>>, vector<1x1x8x8xbf16>
    %52 = vector.shape_cast %51 : vector<1x1x8x8xbf16> to vector<8x8xbf16>
    %53 = vector.shape_cast %50 : vector<8x8xbf16> to vector<1x1x8x8xbf16>
    tpu.vector_store %arg10[%c0_43, %c2_44, %c0_45, %c0_46], %53 {strides = array<i32>} : memref<1x4x8x8xbf16, #tpu.memory_space<vmem>>, vector<1x1x8x8xbf16>,
    %54 = vector.extract_strided_slice %21 {offsets = [0, 16], sizes = [8, 8], strides = [1, 1]} : vector<8x32xbf16> to vector<8x8xbf16>
    %c0_47 = arith.constant 0 : index
    %c2_48 = arith.constant 2 : index
    %c0_49 = arith.constant 0 : index
    %c0_50 = arith.constant 0 : index
    %55 = vector.load %arg11[%c0_47, %c2_48, %c0_49, %c0_50] : memref<1x4x8x8xbf16, #tpu.memory_space<vmem>>, vector<1x1x8x8xbf16>
    %56 = vector.shape_cast %55 : vector<1x1x8x8xbf16> to vector<8x8xbf16>
    %57 = vector.shape_cast %54 : vector<8x8xbf16> to vector<1x1x8x8xbf16>
    tpu.vector_store %arg11[%c0_47, %c2_48, %c0_49, %c0_50], %57 {strides = array<i32>} : memref<1x4x8x8xbf16, #tpu.memory_space<vmem>>, vector<1x1x8x8xbf16>,
    %58 = vector.extract_strided_slice %19 {offsets = [0, 24], sizes = [8, 8], strides = [1, 1]} : vector<8x32xbf16> to vector<8x8xbf16>
    %c0_51 = arith.constant 0 : index
    %c3 = arith.constant 3 : index
    %c0_52 = arith.constant 0 : index
    %c0_53 = arith.constant 0 : index
    %59 = vector.load %arg9[%c0_51, %c3, %c0_52, %c0_53] : memref<1x4x8x8xbf16, #tpu.memory_space<vmem>>, vector<1x1x8x8xbf16>
    %60 = vector.shape_cast %59 : vector<1x1x8x8xbf16> to vector<8x8xbf16>
    %61 = vector.shape_cast %58 : vector<8x8xbf16> to vector<1x1x8x8xbf16>
    tpu.vector_store %arg9[%c0_51, %c3, %c0_52, %c0_53], %61 {strides = array<i32>} : memref<1x4x8x8xbf16, #tpu.memory_space<vmem>>, vector<1x1x8x8xbf16>,
    %62 = vector.extract_strided_slice %20 {offsets = [0, 24], sizes = [8, 8], strides = [1, 1]} : vector<8x32xbf16> to vector<8x8xbf16>
    %c0_54 = arith.constant 0 : index
    %c3_55 = arith.constant 3 : index
    %c0_56 = arith.constant 0 : index
    %c0_57 = arith.constant 0 : index
    %63 = vector.load %arg10[%c0_54, %c3_55, %c0_56, %c0_57] : memref<1x4x8x8xbf16, #tpu.memory_space<vmem>>, vector<1x1x8x8xbf16>
    %64 = vector.shape_cast %63 : vector<1x1x8x8xbf16> to vector<8x8xbf16>
    %65 = vector.shape_cast %62 : vector<8x8xbf16> to vector<1x1x8x8xbf16>
    tpu.vector_store %arg10[%c0_54, %c3_55, %c0_56, %c0_57], %65 {strides = array<i32>} : memref<1x4x8x8xbf16, #tpu.memory_space<vmem>>, vector<1x1x8x8xbf16>,
    %66 = vector.extract_strided_slice %21 {offsets = [0, 24], sizes = [8, 8], strides = [1, 1]} : vector<8x32xbf16> to vector<8x8xbf16>
    %c0_58 = arith.constant 0 : index
    %c3_59 = arith.constant 3 : index
    %c0_60 = arith.constant 0 : index
    %c0_61 = arith.constant 0 : index
    %67 = vector.load %arg11[%c0_58, %c3_59, %c0_60, %c0_61] : memref<1x4x8x8xbf16, #tpu.memory_space<vmem>>, vector<1x1x8x8xbf16>
    %68 = vector.shape_cast %67 : vector<1x1x8x8xbf16> to vector<8x8xbf16>
    %69 = vector.shape_cast %66 : vector<8x8xbf16> to vector<1x1x8x8xbf16>
    tpu.vector_store %arg11[%c0_58, %c3_59, %c0_60, %c0_61], %69 {strides = array<i32>} : memref<1x4x8x8xbf16, #tpu.memory_space<vmem>>, vector<1x1x8x8xbf16>,
    return
  }
  func.func @transform_0(%arg0: i32, %arg1: i32) -> (i32, i32, i32) {
    %c0_i32 = arith.constant 0 : i32
    %c0_i32_0 = arith.constant 0 : i32
    return %arg0, %arg1, %c0_i32 : i32, i32, i32
  }
  func.func @transform_1(%arg0: i32, %arg1: i32) -> (i32, i32) {
    %c0_i32 = arith.constant 0 : i32
    %c0_i32_0 = arith.constant 0 : i32
    %c0_i32_1 = arith.constant 0 : i32
    return %c0_i32, %c0_i32_0 : i32, i32
  }
  func.func @transform_2(%arg0: i32, %arg1: i32) -> (i32, i32) {
    %c0_i32 = arith.constant 0 : i32
    %c0_i32_0 = arith.constant 0 : i32
    %c0_i32_1 = arith.constant 0 : i32
    return %c0_i32, %c0_i32_0 : i32, i32
  }
  func.func @transform_3(%arg0: i32, %arg1: i32) -> (i32, i32) {
    %c0_i32 = arith.constant 0 : i32
    %c0_i32_0 = arith.constant 0 : i32
    %c0_i32_1 = arith.constant 0 : i32
    return %c0_i32, %c0_i32_0 : i32, i32
  }
  func.func @transform_4(%arg0: i32, %arg1: i32) -> (i32, i32) {
    %c0_i32 = arith.constant 0 : i32
    %c0_i32_0 = arith.constant 0 : i32
    %c0_i32_1 = arith.constant 0 : i32
    return %c0_i32, %c0_i32_0 : i32, i32
  }
  func.func @transform_5(%arg0: i32, %arg1: i32) -> (i32, i32) {
    %c0_i32 = arith.constant 0 : i32
    %c0_i32_0 = arith.constant 0 : i32
    %c0_i32_1 = arith.constant 0 : i32
    return %c0_i32, %c0_i32_0 : i32, i32
  }
  func.func @transform_6(%arg0: i32, %arg1: i32) -> (i32, i32) {
    %c0_i32 = arith.constant 0 : i32
    %c0_i32_0 = arith.constant 0 : i32
    %c0_i32_1 = arith.constant 0 : i32
    return %c0_i32, %c0_i32_0 : i32, i32
  }
  func.func @transform_7(%arg0: i32, %arg1: i32) -> (i32, i32, i32, i32) {
    %c0_i32 = arith.constant 0 : i32
    %c0_i32_0 = arith.constant 0 : i32
    %c0_i32_1 = arith.constant 0 : i32
    return %arg0, %c0_i32, %arg1, %c0_i32_0 : i32, i32, i32, i32
  }
  func.func @transform_8(%arg0: i32, %arg1: i32) -> (i32, i32, i32, i32) {
    %c0_i32 = arith.constant 0 : i32
    %c0_i32_0 = arith.constant 0 : i32
    %c0_i32_1 = arith.constant 0 : i32
    return %arg0, %c0_i32, %arg1, %c0_i32_0 : i32, i32, i32, i32
  }
  func.func @transform_9(%arg0: i32, %arg1: i32) -> (i32, i32, i32, i32) {
    %c0_i32 = arith.constant 0 : i32
    %c0_i32_0 = arith.constant 0 : i32
    %c0_i32_1 = arith.constant 0 : i32
    return %arg0, %c0_i32, %arg1, %c0_i32_0 : i32, i32, i32, i32
  }
}

</mosaic_0001>

<bundles_post_ra>
// kernel: tpu_custom_call.1
= control target key start
LH: loop header
LB: loop body
LE: loop exit
PB: predicated region body
PF: predicated region fallthrough
CT: control target
= control target key end

     0   :  { %s1632_s0 = inlined_call_operand.hbm [shape: bf16[2,8,32], index: 0, kind: input, shape index: {}]   ;;  %s1633_s1 = inlined_call_operand.hbm [shape: bf16[32,32], index: 1, kind: input, shape index: {}]   ;;  %s1634_s2 = inlined_call_operand.hbm [shape: bf16[32,32], index: 2, kind: input, shape index: {}]   ;;  %s1635_s3 = inlined_call_operand.hbm [shape: bf16[32,32], index: 3, kind: input, shape index: {}]   ;;  %s1636_s4 = inlined_call_operand.vmem [shape: f32[1,32], index: 4, kind: input, shape index: {}]   ;;  %s1637_s5 = inlined_call_operand.vmem [shape: f32[1,32], index: 5, kind: input, shape index: {}]   ;;  %s1638_s6 = inlined_call_operand.vmem [shape: f32[1,32], index: 6, kind: input, shape index: {}]   ;;  %s1639_s7 = inlined_call_operand.hbm [shape: bf16[2,4,8,8], index: 7, kind: output, shape index: {0}]   ;;  %s1640_s8 = inlined_call_operand.hbm [shape: bf16[2,4,8,8], index: 8, kind: output, shape index: {1}]   ;;  %s1641_s9 = inlined_call_operand.hbm [shape: bf16[2,4,8,8], index: 9, kind: output, shape index: {2}]  }
   0x1   :  { %1644 = sst [smem:[#allocation20_spill]] %s1632_s0 }
   0x2   :  { %1645 = sst [smem:[#allocation21_spill]] %s1633_s1 }
   0x3   :  { %1646 = sst [smem:[#allocation22_spill]] %s1634_s2 }
   0x4   :  { %1647 = sst [smem:[#allocation23_spill]] %s1635_s3 }
   0x5   :  { %1648 = sst [smem:[#allocation24_spill]] %s1636_s4 }
   0x6   :  { %1649 = sst [smem:[#allocation25_spill]] %s1637_s5 }
   0x7   :  { %1650 = sst [smem:[#allocation26_spill]] %s1638_s6 }
   0x8   :  { %15 = vsyncpa [#allocation3], 0 }
   0x9   :  { %17 = vsyncpa [#allocation3 + $0x1], 0 }
   0xa   :  { %18 = vsyncpa [#allocation6], 0 }
   0xb   :  { %19 = vsyncpa [#allocation9], 0 }
   0xc   :  { %20 = vsyncpa [#allocation4], 0 }
   0xd   :  { %22 = vsyncpa [#allocation4 + $0x1], 0 }
   0xe   :  { %23 = vsyncpa [#allocation12], 0 }
   0xf   :  { %25 = vsyncpa [#allocation12 + $0x1], 0  ;;  %s1361_s30 = smov 0   ;;  %s1363_s10 = smov 0  }
  0x10   :  { %s1365_s11 = smov 0   ;;  %s1367_s12 = smov 0  }
  0x11   :  { %s1369_s13 = smov 0   ;;  %s1371_s14 = smov 0  }
  0x12 LB: > { %s1392_s15 = sadd.s32 4294967295, %s1299_s14   ;;  %p845_p0 = scmp.ge.s32.totalorder %s1299_s14, 1  ;;  %s1299_s14 = sphi %s1371_s14, %s31_s14   ;;  %s1295_s13 = sphi %s1369_s13, %s1671_s13   ;;  %s1291_s12 = sphi %s1367_s12, %s1670_s12   ;;  %s1287_s11 = sphi %s1365_s11, %s1669_s11   ;;  %s1283_s10 = sphi %s1363_s10, %s1668_s10   ;;  %s1279_s30 = sphi %s1361_s30, %s1667_s30  }
  0x13   : > { %p66_p1 = scmp.eq.s32.totalorder %s1392_s15, 0  ;;  %p286_p2 = scmp.lt.s32.totalorder %s1299_s14, 3 }
  0x14   : > { %s1651_s1 = sld [smem:[#allocation21_spill]]  ;;  %s1301_s20 = smov [#allocation5]  }
  0x15   : > { %p1400_p3 = pnand %p845_p0, %p286_p2  ;;  %s299_s21 = sshll.u32 %s1301_s20, 4  ;;  %s300_s21 = int_to_ptr.vmem [resolvable:$true] %s299_s21 }
  0x16   : > { %p849_p6 = scmp.ge.s32.totalorder %s1299_s14, 2  ;;  %s1654_s2 = sld [smem:[#allocation22_spill]] }
  0x17   : > { %p936_p4 = pneg %p1400_p3  ;;  %s1302_s26 = smov 64  }
  0x18   : > { %s1303_s27 = smov 4   ;;  %s1304_s28 = smov [#allocation7]  }
  0x19   : > { %p1408_p5 = pnand %p936_p4, %p66_p1  ;;  %s313_s29 = sshll.u32 %s1304_s28, 4  ;;  %s314_s29 = int_to_ptr.vmem [resolvable:$true] %s313_s29 }
  0x1a   : > { %s297_s18 = sshll.u32 %s1651_s1, 4  ;;  %s1655_s3 = sld [smem:[#allocation23_spill]]  ;;  %s298_s18 = int_to_ptr.hbm [resolvable:$true] %s297_s18 }
  0x1b   : > { %939 = dma.hbm_to_vmem [thread:$0]  (!%p1408_p5), %s298_s18, 256, %s300_s21, [#allocation6], %s1302_s26, %s1302_s26, %s1303_s27  }
  0x1c   : > { %s311_s25 = sshll.u32 %s1654_s2, 4  ;;  %s1305_s23 = smov [#allocation8]   ;;  %s312_s25 = int_to_ptr.hbm [resolvable:$true] %s311_s25 }
  0x1d   : > { %942 = dma.hbm_to_vmem [thread:$0]  (!%p1408_p5), %s312_s25, 256, %s314_s29, [#allocation6], %s1302_s26, %s1302_s26, %s1303_s27  }
  0x1e   : > { %s327_s24 = sshll.u32 %s1305_s23, 4  ;;  %s1642_s18 = sadd.s32 4294967294, %s1299_s14   ;;  %s328_s24 = int_to_ptr.vmem [resolvable:$true] %s327_s24 }
  0x1f   : > { %s43_s21 = sadd.s32 1, %s1295_s13  ;;  %s52_s28 = sadd.s32 1, %s1287_s11 }
  0x20   : > { %s325_s20 = sshll.u32 %s1655_s3, 4  ;;  %p45_p7 = scmp.ge.s32.totalorder %s43_s21, 2  ;;  %s326_s20 = int_to_ptr.hbm [resolvable:$true] %s325_s20 }
  0x21   : > { %945 = dma.hbm_to_vmem [thread:$0]  (!%p1408_p5), %s326_s20, 256, %s328_s24, [#allocation9], %s1302_s26, %s1302_s26, %s1303_s27  }
  0x22   : > { %p59_p8 = scmp.ne.s32.totalorder %s1287_s11, %s1283_s10  ;;  %p60_p9 = scmp.eq.s32.totalorder %s1299_s14, 0 }
  0x23   : > { %p65_p10 = scmp.ne.s32.totalorder %s1283_s10, %s1279_s30  ;;  %s1673_s21 = smov (%p45_p7, %s43_s21), 0 }
  0x24   : > { %1656 = sst [smem:[#allocation19_spill]] %s1673_s21  ;;  %p1435_p11 = por %p60_p9, %p59_p8 }
  0x25   : > { %p1441_p12 = por %p66_p1, %p65_p10  ;;  %s47_s26 = ssub.s32 %s1295_s13, %s1673_s21 }
  0x26   : > { %p217_p13 = scmp.eq.s32.totalorder %s1392_s15, 1  ;;  %p50_p0 = scmp.eq.s32.totalorder %s47_s26, 0 }
  0x27   : > { %p223_p2 = scmp.eq.s32.totalorder %s1642_s18, 1  ;;  %p963_p5 = scmp.lt.s32.totalorder %s1299_s14, 2 }
  0x28   : > { %p1450_p4 = por %p217_p13, %p59_p8  ;;  %s350_s17 = sand.u32 1, %s1287_s11  }
  0x29   : > { %s1456_s29 = scalar_select %p50_p0, %s1287_s11, %s52_s28  }
  0x2a   : > { %p1458_p7 = por %p223_p2, %p65_p10  ;;  %s850_s20 = sshll.u32 %s350_s17, 2 }
  0x2b   : > { %s851_s23 = sshll.u32 %s1295_s13, 2  ;;  %s1661_s0 = sld [smem:[#allocation20_spill]] }
  0x2c   : > { %s354_s2 = scalar_lea.vmem [#allocation2], %s850_s20  ;;  %p947_p8 = pnand %p963_p5, %p1435_p11 }
  0x2d   : > { %s363_s18 = sshll.u32 %s354_s2, 4  ;;  %s351_s28 = scalar_lea.sflag [#allocation3], %s350_s17  ;;  %s364_s18 = int_to_ptr.vmem [resolvable:$true] %s363_s18 }
  0x2e   : > { %s1472_s21 = sand.u32 (!%p1400_p3), 1, %s1283_s10  }
  0x2f   : > { %372 = sbr.rel (%p1400_p3) target bundleno = 349 (0x15d), region = 48  ;;  %s853_s1 = sshll.u32 (!%p1400_p3), %s1472_s21, 2 }
  0x30   : > { %s378_s20 = scalar_lea.vmem (!%p1400_p3), [#allocation2], %s853_s1 }
  0x31   : > { %s359_s26 = scalar_lea.hbm %s1661_s0, %s851_s23  ;;  %s375_s23 = scalar_lea.sflag (!%p1400_p3), [#allocation3], %s1472_s21 }
  0x32   : > { %s361_s3 = sshll.u32 %s359_s26, 4  ;;  %s362_s3 = int_to_ptr.hbm [resolvable:$true] %s361_s3 }
  0x33   : > { %949 = dma.hbm_to_vmem [thread:$0]  (!%p947_p8), %s362_s3, 64, %s364_s18, %s351_s28  }
  0x34   : > { %1258 = dma.done.wait (%p1441_p12), %s375_s23, 64  }
  0x35   : > { %1260 = vsyncadd (%p1441_p12), %s375_s23, 4294967232 }
  0x36   : > { %1262 = dma.done.wait (%p66_p1), [#allocation6], 512  }
  0x37   : > { %1264 = vsyncadd (%p66_p1), [#allocation6], 4294966784 }
  0x38   : > { %1266 = dma.done.wait (%p66_p1), [#allocation9], 256  }
  0x39   : > { %1268 = vsyncadd (%p66_p1), [#allocation9], 4294967040  ;;  %v908_v0 = vld [vmem:[#allocation5 + $0x8] sm:$0xff]  ;;  %v910_v1 = vld [vmem:[#allocation7 + $0x8] sm:$0xff]  ;;  %vm461_vm0 = vcmask 261120   ;;  %s1662_s4 = sld [smem:[#allocation24_spill]] }
  0x3a   : > { %v912_v2 = vld [vmem:[#allocation8 + $0x8] sm:$0xff]  ;;  %471 = vmatpush.bf16.msra.mxu0 %v908_v0  ;;  %505 = vmatpush.bf16.msra.mxu1 %v910_v1  ;;  %v907_v3 = vld [vmem:[#allocation5] sm:$0xff]  ;;  %v909_v4 = vld [vmem:[#allocation7] sm:$0xff]  ;;  %s1663_s5 = sld [smem:[#allocation25_spill]]  ;;  %s857_s25 = sshll.u32 %s1472_s21, 4  ;;  %vm548_vm1 = vcmask 60416  }
  0x3b   : > { %538 = vmatpush.bf16.msra.mxu2 %v912_v2  ;;  %v911_v5 = vld [vmem:[#allocation8] sm:$0xff]  ;;  %v440_v6 = vld [vmem:[%s378_s20] sm:$0xf]  ;;  %s1664_s6 = sld [smem:[#allocation26_spill]]  ;;  %s1498_s24 = scalar_lea.vmem [#allocation11], %s857_s25 }
  0x3c   : > { %s1306_s26 = smov 104   ;;  %s1307_s28 = smov 120  }
  0x3d   : > { %s1502_s1 = scalar_lea.vmem [#allocation10], %s857_s25  ;;  %s1308_s23 = smov 112  }
  0x3e   : > { %472 = vmatpush.bf16.msra.mxu0 %v907_v3  ;;  %506 = vmatpush.bf16.msra.mxu1 %v909_v4  ;;  %s1506_s20 = scalar_lea.vmem [#allocation13], %s857_s25  ;;  %s1517_s2 = sshll.u32 %s1291_s12, 4 }
  0x3f   : > { %539 = vmatpush.bf16.msra.mxu2 %v911_v5  ;;  %v1026_v7 = vld [vmem:[%s1662_s4] ss:$0 sm:$0xff]  ;;  %s641_s18 = scalar_lea.hbm %s1640_s8, %s1517_s2  ;;  %s642_s25 = sshll.u32 %s1498_s24, 4  ;;  %s643_s25 = int_to_ptr.vmem [resolvable:$true] %s642_s25 }
  0x40   : > { %v1027_v8 = vld [vmem:[%s1663_s5] ss:$0 sm:$0xff]  ;;  %s605_s22 = sand.u32 1, %s1392_s15   ;;  %s1529_s17 = sshll.u32 %s641_s18, 4  ;;  %s645_s17 = int_to_ptr.hbm [resolvable:$true] %s1529_s17 }
  0x41   : > { %868 = vmatmul.msk.bf16.vlgmr.msra.gmra.mxu0 %vm461_vm0, %v440_v6  ;;  %877 = vmatmul.msk.bf16.vlgmr.msra.gmra.mxu1 %vm461_vm0, %v440_v6  ;;  %v1028_v15 = vld [vmem:[%s1664_s6] ss:$0 sm:$0xff]  ;;  %s623_s19 = scalar_lea.hbm %s1639_s7, %s1517_s2  ;;  %s1544_s15 = scalar_lea.sflag [#allocation12], %s605_s22 }
  0x42   : > { %886 = vmatmul.msk.bf16.vlgmr.msra.gmra.mxu2 %vm461_vm0, %v440_v6  ;;  %s1163_s18 = sshra.s32 %s645_s17, 4  ;;  %s1169_s5 = scalar_lea.hbm %s1640_s8, 32  ;;  %s1164_s18 = int_to_ptr.hbm [resolvable:$true] %s1163_s18 }
  0x43   : > { %s1165_s0 = scalar_lea.hbm %s1164_s18, 16  ;;  %p1170_p10 = scmp.lt.s32.totalorder %s1164_s18, %s1640_s8 }
  0x44   : > { %p1166_p1 = scmp.ne.s32.totalorder %s1164_s18, %s1165_s0  ;;  %p1171_p11 = scmp.lt.s32.totalorder %s1169_s5, %s1165_s0 }
  0x46   : > { %p1167_p3 = pnand %p1166_p1, %p1450_p4  ;;  %p1172_p12 = por %p1171_p11, %p1170_p10 }
  0x48   : > { %p1168_p9 = pneg %p1167_p3 }
  0x4a   : > { %p1173_p13 = pnand %p1172_p12, %p1168_p9 }
  0xbe   : > { %v474_v9 = vpop.f32.mrf.mxu0  ;;  %v508_v10 = vpop.f32.mrf.mxu1 }
  0xbf   : > { %v475_v11 = vadd.f32 %v1026_v7, %v474_v9  ;;  %v509_v12 = vadd.f32 %v1027_v8, %v508_v10 }
  0xc1   : > { %v478_v13 = vmul.f32 0.35355338, %v475_v11  ;;  %v546_v14 = vpack.c.bf16 %v509_v12, %v509_v12 }
  0xc3   : > { %v545_v16 = vpack.c.bf16 %v478_v13, %v478_v13  ;;  %550 = vst.msk [vmem:[%s1498_s24] sm:$0xf] %vm548_vm1, %v546_v14  ;;  %590 = vrot.lane.b32.xlu1 %v546_v14, %s1306_s26  ;;  %559 = vrot.lane.b32.xlu0 %v546_v14, %s1307_s28 }
  0xc5   : > { %549 = vst.msk [vmem:[%s1502_s1] sm:$0xf] %vm548_vm1, %v545_v16  ;;  %570 = vrot.lane.b32.xlu2 %v545_v16, %s1308_s23  ;;  %v541_v17 = vpop.f32.mrf.mxu2 }
  0xc6   : > { %v476_v18 = vpop.f32.mrf.mxu0  ;;  %v510_v19 = vpop.f32.mrf.mxu1  ;;  %v542_v20 = vadd.f32 %v1028_v15, %v541_v17 }
  0xc8   : > { %v547_v21 = vpack.c.bf16 %v542_v20, %v542_v20 }
  0xca   : > { %551 = vst.msk [vmem:[%s1506_s20] sm:$0xf] %vm548_vm1, %v547_v21 }
  0xcb   : > { %575 = vrot.lane.b32.xlu0 %v546_v14, %s1308_s23  ;;  %553 = vrot.lane.b32.xlu1 %v545_v16, %s1307_s28 }
  0xcd   : > { %565 = vrot.lane.b32.xlu2 %v547_v21, %s1307_s28  ;;  %v543_v22 = vpop.f32.mrf.mxu2  ;;  %s659_s28 = scalar_lea.hbm %s1641_s9, %s1517_s2 }
  0xd3   : > { %580 = vrot.lane.b32.xlu0 %v547_v21, %s1308_s23  ;;  %585 = vrot.lane.b32.xlu1 %v545_v16, %s1306_s26 }
  0xd5   : > { %595 = vrot.lane.b32.xlu2 %v547_v21, %s1306_s26 }
 0x11f   : > { %v571_v23 = vpop.permute.xlu2 %570 }
 0x120   : > { %890 = vst.msk [vmem:[%s1502_s1 + $0x8] sm:$0xf] %vm548_vm1, %v571_v23 }
 0x127   : > { %v566_v24 = vpop.permute.xlu2 %565 }
 0x128   : > { %889 = vst.msk [vmem:[%s1506_s20 + $0x4] sm:$0xf] %vm548_vm1, %v566_v24 }
 0x12f   : > { %v596_v25 = vpop.permute.xlu2 %595 }
 0x130   : > { %895 = vst.msk [vmem:[%s1506_s20 + $0xc] sm:$0xf] %vm548_vm1, %v596_v25 }
 0x135   : > { %v591_v26 = vpop.permute.xlu1 %590  ;;  %v560_v27 = vpop.permute.xlu0 %559 }
 0x136   : > { %894 = vst.msk [vmem:[%s1498_s24 + $0xc] sm:$0xf] %vm548_vm1, %v591_v26 }
 0x137   : > { %888 = vst.msk [vmem:[%s1498_s24 + $0x4] sm:$0xf] %vm548_vm1, %v560_v27 }
 0x13d   : > { %v576_v28 = vpop.permute.xlu0 %575  ;;  %v554_v29 = vpop.permute.xlu1 %553 }
 0x13e   : > { %891 = vst.msk [vmem:[%s1498_s24 + $0x8] sm:$0xf] %vm548_vm1, %v576_v28 }
 0x13f   : > { %887 = vst.msk [vmem:[%s1502_s1 + $0x4] sm:$0xf] %vm548_vm1, %v554_v29 }
 0x140   : > { %1176 = shalt.err (!%p1173_p13)
}
 0x141   : > { %s1309_s2 = smov 64   ;;  %s1310_s22 = smov 4  }
 0x142   : > { %931 = dma.vmem_to_hbm [thread:$0]  (%p1450_p4), %s643_s25, 256, %s645_s17, %s1544_s15, %s1309_s2, %s1309_s2, %s1310_s22  }
 0x143   : > { %s624_s4 = sshll.u32 %s1502_s1, 4  ;;  %s1561_s6 = sshll.u32 %s623_s19, 4  ;;  %s625_s4 = int_to_ptr.vmem [resolvable:$true] %s624_s4  ;;  %s627_s6 = int_to_ptr.hbm [resolvable:$true] %s1561_s6 }
 0x144   : > { %s660_s0 = sshll.u32 %s1506_s20, 4  ;;  %s1564_s5 = sshll.u32 %s659_s28, 4  ;;  %s1567_s0 = int_to_ptr.vmem [resolvable:$true] %s660_s0  ;;  %s663_s5 = int_to_ptr.hbm [resolvable:$true] %s1564_s5 }
 0x145   : > { %v581_v30 = vpop.permute.xlu0 %580  ;;  %v586_v31 = vpop.permute.xlu1 %585  ;;  %s601_s25 = scalar_lea.sflag [#allocation4], %s1472_s21  ;;  %s1191_s17 = sshra.s32 %s627_s6, 4  ;;  %s1192_s17 = int_to_ptr.hbm [resolvable:$true] %s1191_s17 }
 0x146   : > { %892 = vst.msk [vmem:[%s1506_s20 + $0x8] sm:$0xf] %vm548_vm1, %v581_v30  ;;  %s1193_s26 = scalar_lea.hbm %s1192_s17, 16  ;;  %s1197_s3 = scalar_lea.hbm %s1639_s7, 32 }
 0x147   : > { %893 = vst.msk [vmem:[%s1502_s1 + $0xc] sm:$0xf] %vm548_vm1, %v586_v31  ;;  %p1194_p0 = scmp.ne.s32.totalorder %s1192_s17, %s1193_s26  ;;  %p1198_p8 = scmp.lt.s32.totalorder %s1192_s17, %s1639_s7 }
 0x148   : > { %p1199_p1 = scmp.lt.s32.totalorder %s1197_s3, %s1193_s26 }
 0x149   : > { %p1195_p2 = pnand %p1194_p0, %p1450_p4 }
 0x14a   : > { %p1200_p3 = por %p1199_p1, %p1198_p8 }
 0x14b   : > { %p1196_p5 = pneg %p1195_p2 }
 0x14d   : > { %p1201_p9 = pnand %p1200_p3, %p1196_p5 }
 0x14f   : > { %1204 = shalt.err (!%p1201_p9)
}
 0x150   : > { %930 = dma.vmem_to_hbm [thread:$0]  (%p1450_p4), %s625_s4, 256, %s627_s6, %s601_s25, %s1309_s2, %s1309_s2, %s1310_s22  }
 0x151   : > { %s1219_s21 = sshra.s32 %s663_s5, 4  ;;  %s1225_s12 = scalar_lea.hbm %s1641_s9, 32  ;;  %s1220_s21 = int_to_ptr.hbm [resolvable:$true] %s1219_s21 }
 0x152   : > { %s1221_s1 = scalar_lea.hbm %s1220_s21, 16  ;;  %p1226_p13 = scmp.lt.s32.totalorder %s1220_s21, %s1641_s9 }
 0x153   : > { %p1222_p10 = scmp.ne.s32.totalorder %s1220_s21, %s1221_s1  ;;  %p1227_p0 = scmp.lt.s32.totalorder %s1225_s12, %s1221_s1 }
 0x155   : > { %p1223_p11 = pnand %p1222_p10, %p1450_p4  ;;  %p1228_p2 = por %p1227_p0, %p1226_p13 }
 0x157   : > { %p1224_p12 = pneg %p1223_p11 }
 0x159   : > { %p1229_p5 = pnand %p1228_p2, %p1224_p12 }
 0x15b   : > { %1232 = shalt.err (!%p1229_p5)
}
 0x15c   : > { %932 = dma.vmem_to_hbm [thread:$0]  (%p1450_p4), %s1567_s0, 256, %s663_s5, %s1544_s15, %s1309_s2, %s1309_s2, %s1310_s22  }
 0x15d PF: > { %s677_s4 = sand.u32 1, %s1279_s30   ;;  %p951_p8 = pnand %p849_p6, %p1458_p7 }
 0x15e   : > { %s678_s6 = scalar_lea.sflag [#allocation4], %s677_s4 }
 0x15f   : > { %p952_p1 = pneg %p951_p8 }
 0x161   : > { %1270 = dma.done.wait (%p952_p1), %s678_s6, 256  }
 0x162   : > { %1272 = vsyncadd (%p952_p1), %s678_s6, 4294967040  ;;  %s1665_s27 = sadd.s32 4294967294, %s1299_s14  }
 0x163   : > { %s687_s25 = sand.u32 1, %s1665_s27  }
 0x164   : > { %s688_s28 = scalar_lea.sflag [#allocation12], %s687_s25 }
 0x165   : > { %1274 = dma.done.wait (%p952_p1), %s688_s28, 512  }
 0x166   : > { %1276 = vsyncadd (%p952_p1), %s688_s28, 4294966784  ;;  %s31_s14 = sadd.s32 1, %s1299_s14   ;;  %s1666_s16 = sld [smem:[#allocation19_spill]] }
 0x167   : > { %p28_p4 = scmp.ge.s32.totalorder %s31_s14, 4   ;;  %s1667_s30 = smov %s1283_s10 }
 0x168   : > { %s1668_s10 = smov %s1287_s11  ;;  %s1669_s11 = smov %s1456_s29 }
 0x169   : > { %s1670_s12 = smov %s1295_s13  ;;  %30 = sbr.rel (!%p28_p4) target bundleno = 18 (0x12), region = 146 }
 0x16c   : > { %s1671_s13 = smov %s1666_s16 }
 0x16e   :  { %704 = vsyncpa [#allocation3], 1 }
 0x16f   :  { %706 = vsyncpa [#allocation3 + $0x1], 1 }
 0x170   :  { %707 = vsyncpa [#allocation6], 1 }
 0x171   :  { %708 = vsyncpa [#allocation9], 1 }
 0x172   :  { %709 = vsyncpa [#allocation4], 1 }
 0x173   :  { %711 = vsyncpa [#allocation4 + $0x1], 1 }
 0x174   :  { %712 = vsyncpa [#allocation12], 1 }
 0x175   :  { %714 = vsyncpa [#allocation12 + $0x1], 1 }

</bundles_post_ra>
